<compile_context>
chip_gen: v5e
topology: v5e:2x2
jax: 0.10.0
libtpu: 0.0.40
codegen_flags: <defaults>
</compile_context>

<pallas_src>
import math
from functools import partial

import jax
import jax.numpy as jnp
from jax.experimental import pallas as pl
from jax.experimental.pallas import tpu as pltpu


def _round_up(x, m):
    return (x + m - 1) // m * m


# ----------------------------------------------------------------------------
# Parameter init (nn.Linear-style) and one-time kernel-layout prep.
# ----------------------------------------------------------------------------
def init_params(key, embedding_dim, internal_dim):
    """Deterministic nn.Linear-style init: U(-1/sqrt(fan_in), 1/sqrt(fan_in)).
    Weights stored already transposed to (in, out) so kernels do x @ W."""
    keys = jax.random.split(key, 8)

    def lin(kw, kb, fan_in, fan_out):
        bound = 1.0 / math.sqrt(fan_in)
        w = jax.random.uniform(kw, (fan_in, fan_out), jnp.float32, -bound, bound)
        b = jax.random.uniform(kb, (1, fan_out), jnp.float32, -bound, bound)
        return w, b

    wq, bq = lin(keys[0], keys[1], embedding_dim, internal_dim)
    wk, bk = lin(keys[2], keys[3], embedding_dim, internal_dim)
    wv, bv = lin(keys[4], keys[5], embedding_dim, internal_dim)
    wo, bo = lin(keys[6], keys[7], internal_dim, embedding_dim)
    return dict(wq=wq, bq=bq, wk=wk, bk=bk, wv=wv, bv=bv, wo=wo, bo=bo)


def prepare_params(params, num_heads, io_dtype=jnp.float32):
    """One-time weight prep (hoisted out of the per-call path):
      * fold 1/sqrt(head_dim) into Wq / bq,
      * build block-diagonal (kron) weights so projections run directly on
        128-lane packed row slabs (lane-dense loads/stores, full MXU width)."""
    E, I = params["wq"].shape
    head_dim = I // num_heads
    scale = 1.0 / math.sqrt(head_dim)
    pack = 128 // E if (E <= 128 and 128 % E == 0) else 1
    eye = jnp.eye(pack, dtype=jnp.float32)
    return dict(
        pack=pack, embedding_dim=E, internal_dim=I, io_dtype=io_dtype,
        wq_bd=jnp.kron(eye, params["wq"] * scale).astype(io_dtype),
        bq_bd=jnp.tile(params["bq"] * scale, (1, pack)),      # f32: added post-accum
        wo_bd=jnp.kron(eye, params["wo"]).astype(io_dtype),
        bo_bd=jnp.tile(params["bo"], (1, pack)),
        wk=params["wk"], bk=params["bk"], wv=params["wv"], bv=params["bv"],
    )


# ----------------------------------------------------------------------------
# Kernel: tiled over packed query-row slabs.
# ----------------------------------------------------------------------------
def _attention_kernel(q_ref, idx_ref, kvp_ref, wq_ref, bq_ref, wo_ref, bo_ref,
                      o_ref, *, nk_pad, pack):
    # Packed Q projection; scale already folded into wq/bq; wq is block-diag.
    qp = jnp.dot(q_ref[...], wq_ref[...],
                 preferred_element_type=jnp.float32) + bq_ref[...]

    # One-hot MXU gather of packed kvp = (k@Wk+bk)*(v@Wv+bv).
    # NOTE: idx rows of a ragged last grid block (and any out-of-range batch
    # value) are only *compared* here, never used as an address; a non-match
    # yields an all-zero one-hot row, and OOB output rows are dropped by the
    # masked store.  Keep it that way if this is ever refactored.
    idx = idx_ref[...]                                    # (rows, pack) int32
    rows = idx.shape[0]
    ncol = pack * nk_pad
    col = jax.lax.broadcasted_iota(jnp.int32, (rows, ncol), 1)
    hit = None
    for s in range(pack):                                  # unrolled, pack<=4
        lo = s * nk_pad
        in_slot = jnp.logical_and(col >= lo, col < lo + nk_pad)
        eq = idx[:, s:s + 1] == (col - lo)
        h = jnp.logical_and(in_slot, eq)
        hit = h if hit is None else jnp.logical_or(hit, h)
    onehot = hit.astype(kvp_ref.dtype)
    kv = jnp.dot(onehot, kvp_ref[...], preferred_element_type=jnp.float32)

    # Elementwise "attention" (per-head elementwise == flat elementwise),
    # then the packed output projection.
    out = (qp * kv).astype(wo_ref.dtype)
    o = jnp.dot(out, wo_ref[...], preferred_element_type=jnp.float32) + bo_ref[...]
    o_ref[...] = o.astype(o_ref.dtype)


# ----------------------------------------------------------------------------
# Wrapper.
# ----------------------------------------------------------------------------
def attention_forward(q, k, v, batch, prepped, *, tile_m=4096):
    """q: (Nq, E) queries; k, v: (Nk, E); batch: (Nq,) int32 row index into k/v."""
    Nq, E = q.shape
    Nk = k.shape[0]
    pack = prepped["pack"]
    I = prepped["internal_dim"]
    dt = prepped["io_dtype"]
    assert E == prepped["embedding_dim"]

    # Per-call combined K/V projection over the tiny Nk rows, in plain jnp
    # (XLA fuses this trivially; no extra Pallas launch / HBM round trip).
    kvp = ((k.astype(jnp.float32) @ prepped["wk"] + prepped["bk"]) *
           (v.astype(jnp.float32) @ prepped["wv"] + prepped["bv"]))      # (Nk, I)
    nk_pad = _round_up(Nk, 8)
    kvp = jnp.pad(kvp, ((0, nk_pad - Nk), (0, 0)))
    # Block-diagonal kvp so the one-hot gather stays packed (lane-dense).
    kvp_bd = jnp.kron(jnp.eye(pack, dtype=jnp.float32), kvp).astype(dt)

    # Pack `pack` query rows per 128-lane slab (a pure reshape: no copy).
    nq_r = _round_up(Nq, pack)
    if nq_r != Nq:  # only pads (a copy) when Nq is not a multiple of `pack`
        q = jnp.pad(q, ((0, nq_r - Nq), (0, 0)))
        batch = jnp.pad(batch, (0, nq_r - Nq))
    nrows = nq_r // pack
    q2 = q.astype(dt).reshape(nrows, pack * E)
    idx2 = batch.astype(jnp.int32).reshape(nrows, pack)

    # Row tiling: big tiles, but >= 2 grid steps when there is enough work
    # (v7x has two TensorCores; also gives DMA/compute pipeline overlap).
    tile_rows = max(8, _round_up(max(1, tile_m // pack), 8))
    if nrows > 8:
        tile_rows = min(tile_rows, _round_up(pl.cdiv(nrows, 2), 8))
    tile_rows = min(tile_rows, _round_up(nrows, 8))
    if nrows < 8:
        tile_rows = nrows                      # full-extent block is allowed
    grid = (pl.cdiv(nrows, tile_rows),)        # ragged last block handled by Pallas

    def resident(shape):
        return pl.BlockSpec(shape, lambda i: (0, 0))

    out = pl.pallas_call(
        partial(_attention_kernel, nk_pad=nk_pad, pack=pack),
        out_shape=jax.ShapeDtypeStruct((nrows, pack * E), dt),
        grid_spec=pltpu.PrefetchScalarGridSpec(
            num_scalar_prefetch=0,
            grid=grid,
            in_specs=[pl.BlockSpec((tile_rows, pack * E), lambda i: (i, 0)),
                      pl.BlockSpec((tile_rows, pack), lambda i: (i, 0)),
                      resident((pack * nk_pad, pack * I)),
                      resident((pack * E, pack * I)),
                      resident((1, pack * I)),
                      resident((pack * I, pack * E)),
                      resident((1, pack * E))],
            out_specs=pl.BlockSpec((tile_rows, pack * E), lambda i: (i, 0)),
        ),
        compiler_params=pltpu.CompilerParams(
            dimension_semantics=("parallel",),            # megacore-shard row tiles
            vmem_limit_bytes=32 * 1024 * 1024,            # covers v5e default; safe on v7x
        ),
    )(q2, idx2, kvp_bd, prepped["wq_bd"], prepped["bq_bd"],
      prepped["wo_bd"], prepped["bo_bd"])

    out = out.reshape(nq_r, E)                 # pure reshape back to (rows, E)
    return out[:Nq] if nq_r != Nq else out


# ----------------------------------------------------------------------------
# Pure-JAX reference mirroring the PyTorch forward exactly.
# ----------------------------------------------------------------------------
def reference_forward(q, k, v, batch, params, *, num_heads):
    qp = q @ params["wq"] + params["bq"]
    kp = k @ params["wk"] + params["bk"]
    vp = v @ params["wv"] + params["bv"]
    n, c = qp.shape
    head_dim = c // num_heads
    qh = qp.reshape(n, num_heads, head_dim)
    kh = kp.reshape(-1, num_heads, head_dim)[batch]
    vh = vp.reshape(-1, num_heads, head_dim)[batch]
    attn = qh * kh / math.sqrt(head_dim)
    out = (attn * vh).reshape(n, -1)
    return out @ params["wo"] + params["bo"]


if __name__ == "__main__":
    embedding_dim = 32
    num_heads = 4
    downsample_rate = 1
    internal_dim = embedding_dim // downsample_rate

    Nq = 1000   # query rows
    Nk = 6      # key/value rows (per-batch pooled features; Nk << Nq)

    key = jax.random.PRNGKey(0)
    key_q, key_k, key_v, key_b, key_p = jax.random.split(key, 5)
    q = jax.random.normal(key_q, (Nq, embedding_dim), jnp.float32)
    k = jax.random.normal(key_k, (Nk, embedding_dim), jnp.float32)
    v = jax.random.normal(key_v, (Nk, embedding_dim), jnp.float32)
    batch = jax.random.randint(key_b, (Nq,), 0, Nk, jnp.int32)

    params = init_params(key_p, embedding_dim, internal_dim)
    ref = reference_forward(q, k, v, batch, params, num_heads=num_heads)

    prepped = prepare_params(params, num_heads)

    # f32: large tile (2-step grid for v7x) and small tile (ragged last block).
    for tm in (4096, 256):
        out = jax.block_until_ready(
            attention_forward(q, k, v, batch, prepped, tile_m=tm))
        assert out.shape == (Nq, embedding_dim)
        assert jnp.allclose(out, ref, atol=1e-4, rtol=1e-4), \
            f"mismatch vs reference (tile_m={tm})"

    # Ragged Nq not a multiple of the packing factor (exercises the pad path).
    nq2 = 997
    ref2 = reference_forward(q[:nq2], k, v, batch[:nq2], params, num_heads=num_heads)
    out2 = jax.block_until_ready(
        attention_forward(q[:nq2], k, v, batch[:nq2], prepped))
    assert out2.shape == (nq2, embedding_dim)
    assert jnp.allclose(out2, ref2, atol=1e-4, rtol=1e-4), "mismatch (ragged Nq)"

    # bf16 I/O variant (halves HBM traffic on v6e/v7x; accumulation stays f32).
    prepped_bf16 = prepare_params(params, num_heads, io_dtype=jnp.bfloat16)
    out_bf = jax.block_until_ready(attention_forward(q, k, v, batch, prepped_bf16))
    assert out_bf.dtype == jnp.bfloat16
    assert jnp.allclose(out_bf.astype(jnp.float32), ref, atol=5e-2, rtol=5e-2), \
        "mismatch (bf16 I/O)"

    print("KERNEL_OK")
</pallas_src>

<mosaic_0001>
module attributes {stable_mosaic.version = 11 : i64} {
  func.func @_attention_kernel(%arg0: i32, %arg1: memref<128x128xf32, #tpu.memory_space<vmem>>, %arg2: memref<128x4xi32, #tpu.memory_space<vmem>>, %arg3: memref<32x128xf32, #tpu.memory_space<vmem>>, %arg4: memref<128x128xf32, #tpu.memory_space<vmem>>, %arg5: memref<1x128xf32, #tpu.memory_space<vmem>>, %arg6: memref<128x128xf32, #tpu.memory_space<vmem>>, %arg7: memref<1x128xf32, #tpu.memory_space<vmem>>, %arg8: memref<128x128xf32, #tpu.memory_space<vmem>>) attributes {dimension_semantics = [#tpu.dimension_semantics<parallel>], iteration_bounds = array<i64: 2>, scalar_prefetch = 0 : i64, scratch_operands = 0 : i64, tpu.core_type = #tpu.core_type<tc>, window_params = [{transform_indices = @transform_0, window_bounds = array<i64: 128, 128>}, {transform_indices = @transform_1, window_bounds = array<i64: 128, 4>}, {pipeline_mode = #tpu.pipeline_mode<synchronous>, transform_indices = @transform_2, window_bounds = array<i64: 32, 128>}, {pipeline_mode = #tpu.pipeline_mode<synchronous>, transform_indices = @transform_3, window_bounds = array<i64: 128, 128>}, {pipeline_mode = #tpu.pipeline_mode<synchronous>, transform_indices = @transform_4, window_bounds = array<i64: 1, 128>}, {pipeline_mode = #tpu.pipeline_mode<synchronous>, transform_indices = @transform_5, window_bounds = array<i64: 128, 128>}, {pipeline_mode = #tpu.pipeline_mode<synchronous>, transform_indices = @transform_6, window_bounds = array<i64: 1, 128>}, {transform_indices = @transform_7, window_bounds = array<i64: 128, 128>}]} {
    %c0 = arith.constant 0 : index
    %c0_0 = arith.constant 0 : index
    %0 = vector.load %arg1[%c0, %c0_0] : memref<128x128xf32, #tpu.memory_space<vmem>>, vector<128x128xf32>
    %c0_1 = arith.constant 0 : index
    %c0_2 = arith.constant 0 : index
    %1 = vector.load %arg4[%c0_1, %c0_2] : memref<128x128xf32, #tpu.memory_space<vmem>>, vector<128x128xf32>
    %cst = arith.constant dense<0.000000e+00> : vector<128x128xf32>
    %2 = tpu.matmul %0, %1, %cst {dimension_numbers = #tpu.dot_dimension_numbers<[1], [0], [0], [1], [0, 0, 1, 1], [], []>} : vector<128x128xf32>, vector<128x128xf32>, vector<128x128xf32> -> vector<128x128xf32>
    %c0_3 = arith.constant 0 : index
    %c0_4 = arith.constant 0 : index
    %3 = vector.load %arg5[%c0_3, %c0_4] : memref<1x128xf32, #tpu.memory_space<vmem>>, vector<1x128xf32>
    %4 = vector.broadcast %3 : vector<1x128xf32> to vector<128x128xf32>
    %5 = arith.addf %2, %4 : vector<128x128xf32>
    %c0_5 = arith.constant 0 : index
    %c0_6 = arith.constant 0 : index
    %6 = vector.load %arg2[%c0_5, %c0_6] : memref<128x4xi32, #tpu.memory_space<vmem>>, vector<128x4xi32>
    %7 = tpu.iota {dimensions = array<i32: 1>} : vector<128x32xi32>
    %c0_i32 = arith.constant 0 : i32
    %8 = vector.broadcast %c0_i32 : i32 to vector<128x32xi32>
    %9 = arith.cmpi sge, %7, %8 : vector<128x32xi32>
    %c8_i32 = arith.constant 8 : i32
    %10 = vector.broadcast %c8_i32 : i32 to vector<128x32xi32>
    %11 = arith.cmpi slt, %7, %10 : vector<128x32xi32>
    %12 = arith.andi %9, %11 : vector<128x32xi1>
    %13 = vector.extract_strided_slice %6 {offsets = [0, 0], sizes = [128, 1], strides = [1, 1]} : vector<128x4xi32> to vector<128x1xi32>
    %c0_i32_7 = arith.constant 0 : i32
    %14 = vector.broadcast %c0_i32_7 : i32 to vector<128x32xi32>
    %15 = arith.subi %7, %14 : vector<128x32xi32>
    %16 = vector.broadcast %13 : vector<128x1xi32> to vector<128x32xi32>
    %17 = arith.cmpi eq, %16, %15 : vector<128x32xi32>
    %18 = arith.andi %12, %17 : vector<128x32xi1>
    %c8_i32_8 = arith.constant 8 : i32
    %19 = vector.broadcast %c8_i32_8 : i32 to vector<128x32xi32>
    %20 = arith.cmpi sge, %7, %19 : vector<128x32xi32>
    %c16_i32 = arith.constant 16 : i32
    %21 = vector.broadcast %c16_i32 : i32 to vector<128x32xi32>
    %22 = arith.cmpi slt, %7, %21 : vector<128x32xi32>
    %23 = arith.andi %20, %22 : vector<128x32xi1>
    %24 = vector.extract_strided_slice %6 {offsets = [0, 1], sizes = [128, 1], strides = [1, 1]} : vector<128x4xi32> to vector<128x1xi32>
    %c8_i32_9 = arith.constant 8 : i32
    %25 = vector.broadcast %c8_i32_9 : i32 to vector<128x32xi32>
    %26 = arith.subi %7, %25 : vector<128x32xi32>
    %27 = vector.broadcast %24 : vector<128x1xi32> to vector<128x32xi32>
    %28 = arith.cmpi eq, %27, %26 : vector<128x32xi32>
    %29 = arith.andi %23, %28 : vector<128x32xi1>
    %30 = arith.ori %18, %29 : vector<128x32xi1>
    %c16_i32_10 = arith.constant 16 : i32
    %31 = vector.broadcast %c16_i32_10 : i32 to vector<128x32xi32>
    %32 = arith.cmpi sge, %7, %31 : vector<128x32xi32>
    %c24_i32 = arith.constant 24 : i32
    %33 = vector.broadcast %c24_i32 : i32 to vector<128x32xi32>
    %34 = arith.cmpi slt, %7, %33 : vector<128x32xi32>
    %35 = arith.andi %32, %34 : vector<128x32xi1>
    %36 = vector.extract_strided_slice %6 {offsets = [0, 2], sizes = [128, 1], strides = [1, 1]} : vector<128x4xi32> to vector<128x1xi32>
    %c16_i32_11 = arith.constant 16 : i32
    %37 = vector.broadcast %c16_i32_11 : i32 to vector<128x32xi32>
    %38 = arith.subi %7, %37 : vector<128x32xi32>
    %39 = vector.broadcast %36 : vector<128x1xi32> to vector<128x32xi32>
    %40 = arith.cmpi eq, %39, %38 : vector<128x32xi32>
    %41 = arith.andi %35, %40 : vector<128x32xi1>
    %42 = arith.ori %30, %41 : vector<128x32xi1>
    %c24_i32_12 = arith.constant 24 : i32
    %43 = vector.broadcast %c24_i32_12 : i32 to vector<128x32xi32>
    %44 = arith.cmpi sge, %7, %43 : vector<128x32xi32>
    %c32_i32 = arith.constant 32 : i32
    %45 = vector.broadcast %c32_i32 : i32 to vector<128x32xi32>
    %46 = arith.cmpi slt, %7, %45 : vector<128x32xi32>
    %47 = arith.andi %44, %46 : vector<128x32xi1>
    %48 = vector.extract_strided_slice %6 {offsets = [0, 3], sizes = [128, 1], strides = [1, 1]} : vector<128x4xi32> to vector<128x1xi32>
    %c24_i32_13 = arith.constant 24 : i32
    %49 = vector.broadcast %c24_i32_13 : i32 to vector<128x32xi32>
    %50 = arith.subi %7, %49 : vector<128x32xi32>
    %51 = vector.broadcast %48 : vector<128x1xi32> to vector<128x32xi32>
    %52 = arith.cmpi eq, %51, %50 : vector<128x32xi32>
    %53 = arith.andi %47, %52 : vector<128x32xi1>
    %54 = arith.ori %42, %53 : vector<128x32xi1>
    %55 = arith.extui %54 : vector<128x32xi1> to vector<128x32xi32>
    %56 = arith.sitofp %55 : vector<128x32xi32> to vector<128x32xf32>
    %c0_14 = arith.constant 0 : index
    %c0_15 = arith.constant 0 : index
    %57 = vector.load %arg3[%c0_14, %c0_15] : memref<32x128xf32, #tpu.memory_space<vmem>>, vector<32x128xf32>
    %cst_16 = arith.constant dense<0.000000e+00> : vector<128x128xf32>
    %58 = tpu.matmul %56, %57, %cst_16 {dimension_numbers = #tpu.dot_dimension_numbers<[1], [0], [0], [1], [0, 0, 1, 1], [], []>} : vector<128x32xf32>, vector<32x128xf32>, vector<128x128xf32> -> vector<128x128xf32>
    %59 = arith.mulf %5, %58 : vector<128x128xf32>
    %c0_17 = arith.constant 0 : index
    %c0_18 = arith.constant 0 : index
    %60 = vector.load %arg6[%c0_17, %c0_18] : memref<128x128xf32, #tpu.memory_space<vmem>>, vector<128x128xf32>
    %cst_19 = arith.constant dense<0.000000e+00> : vector<128x128xf32>
    %61 = tpu.matmul %59, %60, %cst_19 {dimension_numbers = #tpu.dot_dimension_numbers<[1], [0], [0], [1], [0, 0, 1, 1], [], []>} : vector<128x128xf32>, vector<128x128xf32>, vector<128x128xf32> -> vector<128x128xf32>
    %c0_20 = arith.constant 0 : index
    %c0_21 = arith.constant 0 : index
    %62 = vector.load %arg7[%c0_20, %c0_21] : memref<1x128xf32, #tpu.memory_space<vmem>>, vector<1x128xf32>
    %63 = vector.broadcast %62 : vector<1x128xf32> to vector<128x128xf32>
    %64 = arith.addf %61, %63 : vector<128x128xf32>
    %c0_22 = arith.constant 0 : index
    %c0_23 = arith.constant 0 : index
    %65 = vector.load %arg8[%c0_22, %c0_23] : memref<128x128xf32, #tpu.memory_space<vmem>>, vector<128x128xf32>
    tpu.vector_store %arg8[%c0_22, %c0_23], %64 {strides = array<i32>} : memref<128x128xf32, #tpu.memory_space<vmem>>, vector<128x128xf32>,
    return
  }
  func.func @transform_0(%arg0: i32) -> (i32, i32) {
    %c0_i32 = arith.constant 0 : i32
    %c0_i32_0 = arith.constant 0 : i32
    return %arg0, %c0_i32 : i32, i32
  }
  func.func @transform_1(%arg0: i32) -> (i32, i32) {
    %c0_i32 = arith.constant 0 : i32
    %c0_i32_0 = arith.constant 0 : i32
    return %arg0, %c0_i32 : i32, i32
  }
  func.func @transform_2(%arg0: i32) -> (i32, i32) {
    %c0_i32 = arith.constant 0 : i32
    %c0_i32_0 = arith.constant 0 : i32
    %c0_i32_1 = arith.constant 0 : i32
    return %c0_i32, %c0_i32_0 : i32, i32
  }
  func.func @transform_3(%arg0: i32) -> (i32, i32) {
    %c0_i32 = arith.constant 0 : i32
    %c0_i32_0 = arith.constant 0 : i32
    %c0_i32_1 = arith.constant 0 : i32
    return %c0_i32, %c0_i32_0 : i32, i32
  }
  func.func @transform_4(%arg0: i32) -> (i32, i32) {
    %c0_i32 = arith.constant 0 : i32
    %c0_i32_0 = arith.constant 0 : i32
    %c0_i32_1 = arith.constant 0 : i32
    return %c0_i32, %c0_i32_0 : i32, i32
  }
  func.func @transform_5(%arg0: i32) -> (i32, i32) {
    %c0_i32 = arith.constant 0 : i32
    %c0_i32_0 = arith.constant 0 : i32
    %c0_i32_1 = arith.constant 0 : i32
    return %c0_i32, %c0_i32_0 : i32, i32
  }
  func.func @transform_6(%arg0: i32) -> (i32, i32) {
    %c0_i32 = arith.constant 0 : i32
    %c0_i32_0 = arith.constant 0 : i32
    %c0_i32_1 = arith.constant 0 : i32
    return %c0_i32, %c0_i32_0 : i32, i32
  }
  func.func @transform_7(%arg0: i32) -> (i32, i32) {
    %c0_i32 = arith.constant 0 : i32
    %c0_i32_0 = arith.constant 0 : i32
    return %arg0, %c0_i32 : i32, i32
  }
}

</mosaic_0001>

<bundles_post_ra>
// kernel: tpu_custom_call.1
= control target key start
LH: loop header
LB: loop body
LE: loop exit
PB: predicated region body
PF: predicated region fallthrough
CT: control target
= control target key end

     0   :  { %s2413_s0 = inlined_call_operand.vmem [shape: f32[250,128], index: 0, kind: input, shape index: {}]   ;;  %s2414_s1 = inlined_call_operand.vmem [shape: s32[250,4], index: 1, kind: input, shape index: {}]   ;;  %s2415_s2 = inlined_call_operand.hbm [shape: f32[32,128], index: 2, kind: input, shape index: {}]   ;;  %s2416_s3 = inlined_call_operand.hbm [shape: f32[128,128], index: 3, kind: input, shape index: {}]   ;;  %s2417_s4 = inlined_call_operand.vmem [shape: f32[1,128], index: 4, kind: input, shape index: {}]   ;;  %s2418_s5 = inlined_call_operand.hbm [shape: f32[128,128], index: 5, kind: input, shape index: {}]   ;;  %s2419_s6 = inlined_call_operand.vmem [shape: f32[1,128], index: 6, kind: input, shape index: {}]   ;;  %s2420_s7 = inlined_call_operand.hbm [shape: f32[250,128], index: 7, kind: output, shape index: {}]  }
   0x1   :  { %2422 = sst [smem:[#allocation12_spill]] %s2415_s2 }
   0x2   :  { %12 = vsyncpa [#allocation3], 0 }
   0x3   :  { %13 = vsyncpa [#allocation6], 0 }
   0x4   :  { %14 = vsyncpa [#allocation4], 0 }
   0x5   :  { %16 = vsyncpa [#allocation4 + $0x1], 0  ;;  %s1686_s24 = smov 0   ;;  %s1688_s25 = smov 0  }
   0x6   :  { %s1690_s26 = smov 0   ;;  %s1692_s27 = smov 0  }
   0x7 LB: > { %s1707_s28 = sadd.s32 4294967295, %s1632_s27   ;;  %s1242_s29 = sadd.s32 4294967294, %s1632_s27   ;;  %s1632_s27 = sphi %s1692_s27, %s2485_s27   ;;  %s1628_s26 = sphi %s1690_s26, %s2484_s26   ;;  %s1624_s25 = sphi %s1688_s25, %s2483_s25   ;;  %s1620_s24 = sphi %s1686_s24, %s2482_s24  }
   0x8   : > { %s1711_s30 = sadd.s32 1, %s1632_s27   ;;  %s186_s8 = sadd.s32 1, %s1628_s26 }
   0x9   : > { %s183_s9 = ssub.s32 %s1632_s27, %s1711_s30  ;;  %p196_p0 = scmp.ne.s32.totalorder %s1628_s26, %s1624_s25 }
   0xa   : > { %p184_p1 = scmp.eq.s32.totalorder %s183_s9, 0  ;;  %p197_p2 = scmp.eq.s32.totalorder %s1707_s28, 1 }
   0xb   : > { %p202_p3 = scmp.ne.s32.totalorder %s1624_s25, %s1620_s24  ;;  %p203_p4 = scmp.eq.s32.totalorder %s1242_s29, 1 }
   0xc   : > { %s1722_s10 = scalar_select %p184_p1, %s1628_s26, %s186_s8  }
   0xd   : > { %p1724_p5 = por %p197_p2, %p196_p0  ;;  %p1728_p6 = por %p203_p4, %p202_p3 }
   0xe   : > { %p1243_p7 = scmp.ge.s32.totalorder %s1632_s27, 1  ;;  %p210_p8 = scmp.lt.s32.totalorder %s1632_s27, 3 }
   0xf   : > { %p1358_p9 = scmp.eq.s32.totalorder %s1707_s28, 0  ;;  %s235_s16 = sshll.u32 %s2416_s3, 4  ;;  %s236_s16 = int_to_ptr.hbm [resolvable:$true] %s235_s16 }
  0x10   : > { %p1735_p10 = pnand %p1243_p7, %p210_p8  ;;  %s2426_s2 = sld [smem:[#allocation12_spill]] }
  0x11   : > { %s1634_s21 = smov [#allocation5]   ;;  %s1635_s23 = smov 128  }
  0x12   : > { %p1344_p11 = pneg %p1735_p10  ;;  %s237_s22 = sshll.u32 %s1634_s21, 4  ;;  %s238_s22 = int_to_ptr.vmem [resolvable:$true] %s237_s22 }
  0x13   : > { %s1636_s29 = smov 8   ;;  %s1637_s8 = smov [#allocation2]  }
  0x14   : > { %p1749_p12 = pnand %p1358_p9, %p1344_p11  ;;  %s223_s9 = sshll.u32 %s1637_s8, 4  ;;  %s224_s9 = int_to_ptr.vmem [resolvable:$true] %s223_s9 }
  0x15   : > { %s252_s17 = sshll.u32 %s2418_s5, 4  ;;  %s1638_s18 = smov [#allocation7]   ;;  %s253_s17 = int_to_ptr.hbm [resolvable:$true] %s252_s17 }
  0x16   : > { %s221_s19 = sshll.u32 %s2426_s2, 4  ;;  %s254_s2 = sshll.u32 %s1638_s18, 4  ;;  %s222_s19 = int_to_ptr.hbm [resolvable:$true] %s221_s19  ;;  %s255_s2 = int_to_ptr.vmem [resolvable:$true] %s254_s2 }
  0x17   : > { %1350 = dma.hbm_to_vmem [thread:$0]  (!%p1749_p12), %s236_s16, 2048, %s238_s22, [#allocation6], %s1635_s23, %s1635_s23, %s1636_s29  }
  0x18   : > { %1347 = dma.hbm_to_vmem [thread:$0]  (!%p1749_p12), %s222_s19, 512, %s224_s9, [#allocation3], %s1635_s23, %s1635_s23, %s1636_s29  }
  0x19   : > { %1353 = dma.hbm_to_vmem [thread:$0]  (!%p1749_p12), %s253_s17, 2048, %s255_s2, [#allocation6], %s1635_s23, %s1635_s23, %s1636_s29  }
  0x1a   : > { %291 = sbr.rel (%p1735_p10) target bundleno = 644 (0x284), region = 48 }
  0x1f   : > { %1607 = dma.done.wait (%p1358_p9), [#allocation3], 512  }
  0x20   : > { %1609 = vsyncadd (%p1358_p9), [#allocation3], 4294966784 }
  0x21   : > { %1611 = dma.done.wait (%p1358_p9), [#allocation6], 4096  }
  0x22   : > { %1613 = vsyncadd (%p1358_p9), [#allocation6], 4294963200  ;;  %s1253_s16 = sshll.u32 %s1707_s28, 4  ;;  %v1639_v0 = vmov 2   ;;  %v1640_v1 = vmov 1   ;;  %v1641_v2 = vmov 0   ;;  %v469_v41 = vlaneseq }
  0x23   : > { %1410 = vset.pattern.permute.xlu1 %v1639_v0  ;;  %1409 = vset.pattern.permute.xlu0 %v1640_v1  ;;  %p340_p13 = scmp.lt.s32.totalorder %s1253_s16, 31  ;;  %v1642_v6 = vmov 3   ;;  %v383_v13 = vld [vmem:[#allocation5 + $0x78] sm:$0xff]  ;;  %v382_v14 = vld [vmem:[#allocation5 + $0x70] sm:$0xff]  ;;  %v381_v15 = vld [vmem:[#allocation5 + $0x68] sm:$0xff]  ;;  %s336_s9 = sand.u32 1, %s1624_s25  }
  0x24   : > { %1412 = vset.pattern.permute.xlu2 %v1641_v2  ;;  %388 = vmatpush.msra.mxu0 %v383_v13  ;;  %v380_v16 = vld [vmem:[#allocation5 + $0x60] sm:$0xff]  ;;  %v379_v17 = vld [vmem:[#allocation5 + $0x58] sm:$0xff]  ;;  %v378_v18 = vld [vmem:[#allocation5 + $0x50] sm:$0xff]  ;;  %v1868_v46 = vand.u32 127, %v469_v41  ;;  %s1252_s14 = sshll.u32 %s336_s9, 7  ;;  %s1122_s22 = scalar_lea.sflag [#allocation4], %s336_s9 }
  0x25   : > { %s2487_s16 = smov (!%p340_p13, %s1253_s16), 31  ;;  %1298 = vmatpush.msra.mxu3 %v383_v13  ;;  %v377_v20 = vld [vmem:[#allocation5 + $0x48] sm:$0xff]  ;;  %v376_v21 = vld [vmem:[#allocation5 + $0x40] sm:$0xff]  ;;  %v375_v22 = vld [vmem:[#allocation5 + $0x38] sm:$0xff]  ;;  %s2342_s18 = scalar_lea.vmem [#allocation8], %s1252_s14 }
  0x26   : > { %s1254_s2 = sshll.u32 %s2487_s16, 3  ;;  %389 = vmatpush.msra.mxu0 %v382_v14  ;;  %v374_v24 = vld [vmem:[#allocation5 + $0x30] sm:$0xff]  ;;  %v373_v25 = vld [vmem:[#allocation5 + $0x28] sm:$0xff]  ;;  %v372_v26 = vld [vmem:[#allocation5 + $0x20] sm:$0xff]  ;;  %v1874_v47 = vadd.s32 4294967288, %v1868_v46  ;;  %vm554_vm0 = vcmp.ge.s32.totalorder %v1868_v46, 8 }
  0x27   : > { %s1784_s20 = scalar_lea.vmem %s2414_s1, %s1254_s2  ;;  %1299 = vmatpush.msra.mxu3 %v382_v14  ;;  %v371_v27 = vld [vmem:[#allocation5 + $0x18] sm:$0xff]  ;;  %v370_v30 = vld [vmem:[#allocation5 + $0x10] sm:$0xff]  ;;  %v369_v32 = vld [vmem:[#allocation5 + $0x8] sm:$0xff]  ;;  %s1848_s23 = scalar_lea.vmem %s2413_s0, %s1254_s2  ;;  %vm555_vm1 = vcmp.lt.s32.totalorder %v1868_v46, 16  ;;  %vm654_vm2 = vcmp.ge.s32.totalorder %v1868_v46, 16  ;;  %vm655_vm3 = vcmp.lt.s32.totalorder %v1868_v46, 24 }
  0x28   : > { %v453_v3 = vld [vmem:[%s1784_s20] sm:$0xff]  ;;  %v454_v4 = vld [vmem:[%s1784_s20 + $0x8] sm:$0xff]  ;;  %v455_v8 = vld [vmem:[%s1784_s20 + $0x10] sm:$0xff]  ;;  %390 = vmatpush.msra.mxu0 %v381_v15  ;;  %vm2421_vm4 = vcmp.lt.s32.totalorder %v1868_v46, 8  ;;  %v1887_v51 = vadd.s32 4294967280, %v1868_v46  ;;  %v1901_v54 = vadd.s32 4294967272, %v1868_v46 }
  0x29   : > { %659 = vperm.xlu1 %1410, %v453_v3   ;;  %559 = vperm.xlu0 %1409, %v453_v3   ;;  %v457_v5 = vld [vmem:[%s1784_s20 + $0x20] sm:$0xff]  ;;  %v458_v7 = vld [vmem:[%s1784_s20 + $0x28] sm:$0xff]  ;;  %v456_v9 = vld [vmem:[%s1784_s20 + $0x18] sm:$0xff]  ;;  %vm754_vm10 = vcmp.ge.s32.totalorder %v1868_v46, 24  ;;  %vm755_vm11 = vcmp.lt.s32.totalorder %v1868_v46, 32  ;;  %s1297_s16 = sshll.u32 %s1707_s28, 7 }
  0x2a   : > { %478 = vperm.xlu2 %1412, %v454_v4   ;;  %v1804_v10 = vld [vmem:[%s1784_s20 + $0x38] sm:$0xff]  ;;  %v1817_v11 = vld [vmem:[%s1784_s20 + $0x40] sm:$0xff]  ;;  %v459_v12 = vld [vmem:[%s1784_s20 + $0x30] sm:$0xff]  ;;  %1300 = vmatpush.msra.mxu3 %v381_v15  ;;  %s1133_s19 = scalar_lea.hbm %s2420_s7, %s1297_s16  ;;  %s1582_s14 = scalar_lea.hbm %s2420_s7, 256 }
  0x2b   : > { %391 = vmatpush.msra.mxu0 %v380_v16  ;;  %v1827_v19 = vld [vmem:[%s1784_s20 + $0x48] sm:$0xff]  ;;  %v889_v28 = vld [vmem:[#allocation2 + $0x18] sm:$0xff]  ;;  %v888_v31 = vld [vmem:[#allocation2 + $0x10] sm:$0xff]  ;;  %s1136_s21 = sshll.u32 %s1133_s19, 4  ;;  %s1137_s21 = int_to_ptr.hbm [resolvable:$true] %s1136_s21 }
  0x2c   : > { %1301 = vmatpush.msra.mxu3 %v380_v16  ;;  %951 = vmatpush.msra.mxu1 %v889_v28  ;;  %v1851_v33 = vld [vmem:[%s1784_s20 + $0x50] sm:$0xff]  ;;  %v887_v34 = vld [vmem:[#allocation2 + $0x8] sm:$0xff]  ;;  %v368_v35 = vld [vmem:[#allocation5] sm:$0xff] }
  0x2d   : > { %392 = vmatpush.msra.mxu0 %v379_v17  ;;  %v352_v38 = vld [vmem:[%s1848_s23] sm:$0xff]  ;;  %v353_v44 = vld [vmem:[%s1848_s23 + $0x8] sm:$0xff]  ;;  %v354_v48 = vld [vmem:[%s1848_s23 + $0x10] sm:$0xff] }
  0x2e   : > { %1302 = vmatpush.msra.mxu3 %v379_v17  ;;  %952 = vmatpush.msra.mxu1 %v888_v31  ;;  %v886_v39 = vld [vmem:[#allocation2] sm:$0xff]  ;;  %vm1889_vm6 = vmand %vm554_vm0, %vm555_vm1  ;;  %v355_v61 = vld [vmem:[%s1848_s23 + $0x18] sm:$0xff] }
  0x2f   : > { %393 = vmatpush.msra.mxu0 %v378_v18  ;;  %vm1896_vm8 = vmand %vm654_vm2, %vm655_vm3  ;;  %v1941_v60 = vld [vmem:[%s1784_s20 + $0x60] sm:$0xff]  ;;  %vm890_vm2 = vcmask 261120   ;;  %v464_v16 = vld [vmem:[%s1784_s20 + $0x58] sm:$0xff] }
  0x30   : > { %1303 = vmatpush.msra.mxu3 %v378_v18  ;;  %953 = vmatpush.msra.mxu1 %v887_v34  ;;  %vm1924_vm15 = vmand %vm754_vm10, %vm755_vm11  ;;  %v359_v41 = vld [vmem:[%s1848_s23 + $0x38] sm:$0xff]  ;;  %v361_v59 = vld [vmem:[%s1848_s23 + $0x48] sm:$0xff] }
  0x31   : > { %1411 = vset.pattern.permute.xlu1 %v1642_v6  ;;  %1424 = vset.pattern.permute.xlu0 %v1639_v0  ;;  %v362_v13 = vld [vmem:[%s1848_s23 + $0x50] sm:$0xff] }
  0x32   : > { %759 = vperm.xlu1 %1411, %v453_v3   ;;  %671 = vperm.xlu0 %1424, %v457_v5  }
  0x33   : > { %1413 = vset.pattern.permute.xlu2 %v1640_v1  ;;  %394 = vmatpush.msra.mxu0 %v377_v20 }
  0x34   : > { %562 = vperm.xlu2 %1413, %v454_v4   ;;  %1304 = vmatpush.msra.mxu3 %v377_v20 }
  0x35   : > { %395 = vmatpush.msra.mxu0 %v376_v21  ;;  %954 = vmatpush.msra.mxu1 %v886_v39 }
  0x36   : > { %1305 = vmatpush.msra.mxu3 %v376_v21  ;;  %v357_v21 = vld [vmem:[%s1848_s23 + $0x28] sm:$0xff] }
  0x37   : > { %396 = vmatpush.msra.mxu0 %v375_v22 }
  0x38   : > { %1306 = vmatpush.msra.mxu3 %v375_v22 }
  0x39   : > { %397 = vmatpush.msra.mxu0 %v374_v24 }
  0x3a   : > { %1414 = vset.pattern.permute.xlu1 %v1639_v0  ;;  %1429 = vset.pattern.permute.xlu0 %v1642_v6 }
  0x3b   : > { %662 = vperm.xlu1 %1414, %v454_v4   ;;  %774 = vperm.xlu0 %1429, %v458_v7  }
  0x3c   : > { %1415 = vset.pattern.permute.xlu2 %v1642_v6  ;;  %1307 = vmatpush.msra.mxu3 %v374_v24 }
  0x3d   : > { %762 = vperm.xlu2 %1415, %v454_v4   ;;  %398 = vmatpush.msra.mxu0 %v373_v25 }
  0x3e   : > { %1308 = vmatpush.msra.mxu3 %v373_v25  ;;  %v1020_v25 = vld [vmem:[#allocation7] sm:$0xff] }
  0x3f   : > { %399 = vmatpush.msra.mxu0 %v372_v26 }
  0x40   : > { %1309 = vmatpush.msra.mxu3 %v372_v26 }
  0x41   : > { %400 = vmatpush.msra.mxu0 %v371_v27 }
  0x42   : > { %1310 = vmatpush.msra.mxu3 %v371_v27  ;;  %v2052_v27 = vld [vmem:[%s1784_s20 + $0x70] sm:$0xff] }
  0x43   : > { %1416 = vset.pattern.permute.xlu1 %v1640_v1  ;;  %1430 = vset.pattern.permute.xlu0 %v1641_v2 }
  0x44   : > { %565 = vperm.xlu1 %1416, %v455_v8   ;;  %475 = vperm.xlu0 %1430, %v453_v3  }
  0x45   : > { %1417 = vset.pattern.permute.xlu2 %v1639_v0  ;;  %401 = vmatpush.msra.mxu0 %v370_v30 }
  0x46   : > { %665 = vperm.xlu2 %1417, %v455_v8   ;;  %1311 = vmatpush.msra.mxu3 %v370_v30 }
  0x47   : > { %402 = vmatpush.msra.mxu0 %v369_v32 }
  0x48   : > { %1312 = vmatpush.msra.mxu3 %v369_v32  ;;  %v358_v32 = vld [vmem:[%s1848_s23 + $0x30] sm:$0xff] }
  0x49   : > { %403 = vmatpush.msra.mxu0 %v368_v35 }
  0x4a   : > { %404 = vmatmul.f32.vlgmr.msra.gmra.mxu0 %v352_v38  ;;  %1313 = vmatpush.msra.mxu3 %v368_v35 }
  0x4c   : > { %1418 = vset.pattern.permute.xlu1 %v1642_v6  ;;  %481 = vperm.xlu0 %1430, %v455_v8  }
  0x4d   : > { %765 = vperm.xlu1 %1418, %v455_v8   ;;  %v1028_v8 = vld [vmem:[#allocation7 + $0x40] sm:$0xff] }
  0x4e   : > { %1419 = vset.pattern.permute.xlu2 %v1641_v2 }
  0x4f   : > { %484 = vperm.xlu2 %1419, %v456_v9  }
  0x52   : > { %407 = vmatmul.f32.gmra.mxu0 %v353_v44  ;;  %v360_v44 = vld [vmem:[%s1848_s23 + $0x40] sm:$0xff] }
  0x54   : > { %496 = vperm.xlu0 %1430, %v1804_v10  }
  0x55   : > { %1420 = vset.pattern.permute.xlu1 %v1639_v0 }
  0x56   : > { %668 = vperm.xlu1 %1420, %v456_v9  }
  0x57   : > { %1421 = vset.pattern.permute.xlu2 %v1642_v6 }
  0x58   : > { %768 = vperm.xlu2 %1421, %v456_v9  }
  0x5a   : > { %410 = vmatmul.f32.gmra.mxu0 %v354_v48 }
  0x5c   : > { %1435 = vset.pattern.permute.xlu0 %v1640_v1 }
  0x5d   : > { %568 = vperm.xlu0 %1435, %v456_v9   ;;  %v1643_v9 = vmov 0.0  }
  0x5e   : > { %1422 = vset.pattern.permute.xlu1 %v1641_v2 }
  0x5f   : > { %487 = vperm.xlu1 %1422, %v457_v5  }
  0x60   : > { %1423 = vset.pattern.permute.xlu2 %v1640_v1 }
  0x61   : > { %571 = vperm.xlu2 %1423, %v457_v5  }
  0x62   : > { %413 = vmatmul.f32.gmra.mxu0 %v355_v61  ;;  %v1031_v61 = vld [vmem:[#allocation7 + $0x58] sm:$0xff] }
  0x65   : > { %583 = vperm.xlu0 %1435, %v1817_v11  }
  0x67   : > { %1425 = vset.pattern.permute.xlu1 %v1642_v6 }
  0x68   : > { %771 = vperm.xlu1 %1425, %v457_v5  }
  0x69   : > { %1426 = vset.pattern.permute.xlu2 %v1641_v2 }
  0x6a   : > { %490 = vperm.xlu2 %1426, %v458_v7  }
  0x6d   : > { %1444 = vset.pattern.permute.xlu0 %v1639_v0 }
  0x6e   : > { %686 = vperm.xlu0 %1444, %v1827_v19  }
  0x70   : > { %1427 = vset.pattern.permute.xlu1 %v1640_v1 }
  0x71   : > { %574 = vperm.xlu1 %1427, %v458_v7  }
  0x72   : > { %1428 = vset.pattern.permute.xlu2 %v1639_v0 }
  0x73   : > { %674 = vperm.xlu2 %1428, %v458_v7  }
  0x76   : > { %1449 = vset.pattern.permute.xlu0 %v1642_v6 }
  0x77   : > { %789 = vperm.xlu0 %1449, %v1851_v33  }
  0x79   : > { %1431 = vset.pattern.permute.xlu1 %v1641_v2 }
  0x7a   : > { %493 = vperm.xlu1 %1431, %v459_v12  }
  0x7b   : > { %1432 = vset.pattern.permute.xlu2 %v1640_v1 }
  0x7c   : > { %577 = vperm.xlu2 %1432, %v459_v12  }
  0x7f   : > { %1454 = vset.pattern.permute.xlu0 %v1641_v2 }
  0x80   : > { %511 = vperm.xlu0 %1454, %v1941_v60  }
  0x82   : > { %1433 = vset.pattern.permute.xlu1 %v1639_v0 }
  0x83   : > { %677 = vperm.xlu1 %1433, %v459_v12  }
  0x84   : > { %1434 = vset.pattern.permute.xlu2 %v1642_v6  ;;  %v1830_v23 = vpop.permute.xlu2 %478 }
  0x85   : > { %777 = vperm.xlu2 %1434, %v459_v12   ;;  %vm523_vm5 = vcmp.eq.s32.totalorder %v1830_v23, %v1868_v46  ;;  %v1987_v12 = vld [vmem:[%s1784_s20 + $0x68] sm:$0xff] }
  0x86   : > { %vm1908_vm9 = vmand %vm2421_vm4, %vm523_vm5 }
  0x88   : > { %1459 = vset.pattern.permute.xlu0 %v1640_v1 }
  0x89   : > { %598 = vperm.xlu0 %1459, %v1987_v12  }
  0x8b   : > { %1436 = vset.pattern.permute.xlu1 %v1640_v1 }
  0x8c   : > { %580 = vperm.xlu1 %1436, %v1804_v10  }
  0x8d   : > { %1437 = vset.pattern.permute.xlu2 %v1639_v0 }
  0x8e   : > { %680 = vperm.xlu2 %1437, %v1804_v10   ;;  %v1838_v29 = vpop.permute.xlu2 %562 }
  0x8f   : > { %vm607_vm7 = vcmp.eq.s32.totalorder %v1838_v29, %v1874_v47 }
  0x90   : > { %vm1918_vm13 = vmand %vm1889_vm6, %vm607_vm7 }
  0x91   : > { %1464 = vset.pattern.permute.xlu0 %v1639_v0 }
  0x92   : > { %701 = vperm.xlu0 %1464, %v2052_v27  }
  0x94   : > { %1438 = vset.pattern.permute.xlu1 %v1642_v6 }
  0x95   : > { %780 = vperm.xlu1 %1438, %v1804_v10  }
  0x96   : > { %1439 = vset.pattern.permute.xlu2 %v1641_v2 }
  0x97   : > { %499 = vperm.xlu2 %1439, %v1817_v11   ;;  %v1855_v40 = vpop.permute.xlu2 %762 }
  0x9a   : > { %1469 = vset.pattern.permute.xlu0 %v1642_v6 }
  0x9b   : > { %v660_v36 = vpop.permute.xlu1 %659  ;;  %v560_v37 = vpop.permute.xlu0 %559 }
  0x9c   : > { %vm706_vm12 = vcmp.eq.s32.totalorder %v660_v36, %v1887_v51  ;;  %vm606_vm14 = vcmp.eq.s32.totalorder %v560_v37, %v1874_v47  ;;  %v468_v37 = vld [vmem:[%s1784_s20 + $0x78] sm:$0xff]  ;;  %s1134_s20 = sshll.u32 %s2342_s18, 4  ;;  %s1135_s20 = int_to_ptr.vmem [resolvable:$true] %s1134_s20 }
  0x9d   : > { %1440 = vset.pattern.permute.xlu1 %v1639_v0  ;;  %vm1931_vm1 = vmand %vm1896_vm8, %vm706_vm12  ;;  %804 = vperm.xlu0 %1469, %v468_v37  }
  0x9e   : > { %683 = vperm.xlu1 %1440, %v1817_v11   ;;  %vm1946_vm5 = vmand %vm1889_vm6, %vm606_vm14  ;;  %vm807_vm14 = vcmp.eq.s32.totalorder %v1855_v40, %v1901_v54 }
  0x9f   : > { %1441 = vset.pattern.permute.xlu2 %v1642_v6 }
  0xa0   : > { %783 = vperm.xlu2 %1441, %v1817_v11   ;;  %v1866_v45 = vpop.permute.xlu2 %665  ;;  %v356_v11 = vld [vmem:[%s1848_s23 + $0x20] sm:$0xff] }
  0xa1   : > { %416 = vmatmul.f32.gmra.mxu0 %v356_v11 }
  0xa4   : > { %v760_v42 = vpop.permute.xlu1 %759  ;;  %v1862_v43 = vpop.permute.xlu0 %671 }
  0xa5   : > { %vm806_vm0 = vcmp.eq.s32.totalorder %v760_v42, %v1901_v54 }
  0xa6   : > { %1442 = vset.pattern.permute.xlu1 %v1641_v2  ;;  %vm1953_vm7 = vmand %vm1924_vm15, %vm806_vm0 }
  0xa7   : > { %502 = vperm.xlu1 %1442, %v1827_v19  }
  0xa8   : > { %1443 = vset.pattern.permute.xlu2 %v1640_v1 }
  0xa9   : > { %586 = vperm.xlu2 %1443, %v1827_v19   ;;  %v1904_v55 = vpop.permute.xlu2 %484  ;;  %419 = vmatmul.f32.gmra.mxu0 %v357_v21 }
  0xad   : > { %v663_v49 = vpop.permute.xlu1 %662  ;;  %v1881_v50 = vpop.permute.xlu0 %774 }
  0xae   : > { %vm707_vm3 = vcmp.eq.s32.totalorder %v663_v49, %v1887_v51 }
  0xaf   : > { %1445 = vset.pattern.permute.xlu1 %v1642_v6  ;;  %vm1960_vm11 = vmand %vm1896_vm8, %vm707_vm3 }
  0xb0   : > { %786 = vperm.xlu1 %1445, %v1827_v19  }
  0xb1   : > { %1446 = vset.pattern.permute.xlu2 %v1641_v2  ;;  %422 = vmatmul.f32.gmra.mxu0 %v358_v32 }
  0xb2   : > { %505 = vperm.xlu2 %1446, %v1851_v33   ;;  %v769_v7 = vpop.permute.xlu2 %768 }
  0xb6   : > { %v566_v63 = vpop.permute.xlu1 %565  ;;  %v476_v3 = vpop.permute.xlu0 %475 }
  0xb7   : > { %vm522_vm10 = vcmp.eq.s32.totalorder %v476_v3, %v1868_v46  ;;  %v1029_v3 = vld [vmem:[#allocation7 + $0x48] sm:$0xff] }
  0xb8   : > { %1447 = vset.pattern.permute.xlu1 %v1640_v1  ;;  %vm538_vm12 = vmand %vm2421_vm4, %vm522_vm10 }
  0xb9   : > { %589 = vperm.xlu1 %1447, %v1851_v33   ;;  %vm638_vm0 = vmor %vm538_vm12, %vm1946_vm5  ;;  %425 = vmatmul.f32.gmra.mxu0 %v359_v41 }
  0xba   : > { %1448 = vset.pattern.permute.xlu2 %v1639_v0  ;;  %vm738_vm3 = vmor %vm638_vm0, %vm1931_vm1  ;;  %vm708_vm0 = vcmp.eq.s32.totalorder %v1866_v45, %v1887_v51 }
  0xbb   : > { %689 = vperm.xlu2 %1448, %v1851_v33   ;;  %vm838_vm10 = vmor %vm738_vm3, %vm1953_vm7  ;;  %vm608_vm7 = vcmp.eq.s32.totalorder %v566_v63, %v1874_v47  ;;  %v572_v17 = vpop.permute.xlu2 %571  ;;  %v1030_v63 = vld [vmem:[#allocation7 + $0x50] sm:$0xff] }
  0xbc   : > { %vm1980_vm4 = vmand %vm1924_vm15, %vm807_vm14  ;;  %v1260_v10 = vsel %vm838_vm10, 1.0, %v1643_v9 }
  0xbd   : > { %vm2448_vm1 = vmor %vm1908_vm9, %vm1918_vm13  ;;  %1276 = vmatmul.msk.f32.vlgmr.msra.gmra.mxu1 %vm890_vm2, %v1260_v10  ;;  %vm2451_vm9 = vcmp.lt.s32.totalorder %v1868_v46, 8  ;;  %v1027_v10 = vld [vmem:[#allocation7 + $0x38] sm:$0xff] }
  0xbe   : > { %vm1996_vm5 = vmor %vm2448_vm1, %vm1960_vm11  ;;  %v482_v14 = vpop.permute.xlu0 %481 }
  0xbf   : > { %vm524_vm12 = vcmp.eq.s32.totalorder %v482_v14, %v1868_v46  ;;  %v766_v15 = vpop.permute.xlu1 %765  ;;  %vm839_vm11 = vmor %vm1996_vm5, %vm1980_vm4  ;;  %v1026_v14 = vld [vmem:[#allocation7 + $0x30] sm:$0xff] }
  0xc0   : > { %vm540_vm13 = vmand %vm2451_vm9, %vm524_vm12  ;;  %vm808_vm10 = vcmp.eq.s32.totalorder %v766_v15, %v1901_v54  ;;  %v1261_v18 = vsel %vm839_vm11, 1.0, %v1643_v9  ;;  %vm525_vm12 = vcmp.eq.s32.totalorder %v1904_v55, %v1868_v46  ;;  %vm809_vm9 = vcmp.eq.s32.totalorder %v769_v7, %v1901_v54  ;;  %v1034_v55 = vld [vmem:[#allocation7 + $0x70] sm:$0xff]  ;;  %v1025_v15 = vld [vmem:[#allocation7 + $0x28] sm:$0xff] }
  0xc1   : > { %1450 = vset.pattern.permute.xlu1 %v1641_v2  ;;  %vm624_vm14 = vmand %vm1889_vm6, %vm608_vm7  ;;  %vm2454_vm11 = vcmp.lt.s32.totalorder %v1868_v46, 8  ;;  %428 = vmatmul.f32.gmra.mxu0 %v360_v44 }
  0xc2   : > { %508 = vperm.xlu1 %1450, %v464_v16   ;;  %vm640_vm3 = vmor %vm540_vm13, %vm624_vm14 }
  0xc3   : > { %1451 = vset.pattern.permute.xlu2 %v1640_v1  ;;  %vm724_vm4 = vmand %vm1896_vm8, %vm708_vm0 }
  0xc4   : > { %592 = vperm.xlu2 %1451, %v464_v16   ;;  %vm2022_vm1 = vmor %vm640_vm3, %vm724_vm4  ;;  %v491_v23 = vpop.permute.xlu2 %490 }
  0xc5   : > { %1277 = vmatmul.msk.f32.gmra.mxu1 %vm890_vm2, %v1261_v18  ;;  %vm824_vm5 = vmand %vm1924_vm15, %vm808_vm10  ;;  %v1023_v18 = vld [vmem:[#allocation7 + $0x18] sm:$0xff] }
  0xc6   : > { %v2027_v20 = vpop.permute.xlu0 %496  ;;  %vm840_vm7 = vmor %vm2022_vm1, %vm824_vm5  ;;  %vm610_vm1 = vcmp.eq.s32.totalorder %v572_v17, %v1874_v47 }
  0xc7   : > { %v1262_v24 = vsel %vm840_vm7, 1.0, %v1643_v9  ;;  %vm541_vm14 = vmand %vm2454_vm11, %vm525_vm12 }
  0xc8   : > { %v669_v22 = vpop.permute.xlu1 %668  ;;  %vm2047_vm0 = vmand %vm1924_vm15, %vm809_vm9  ;;  %vm710_vm9 = vcmp.eq.s32.totalorder %v1862_v43, %v1887_v51 }
  0xc9   : > { %vm709_vm13 = vcmp.eq.s32.totalorder %v669_v22, %v1887_v51  ;;  %431 = vmatmul.f32.gmra.mxu0 %v361_v59 }
  0xca   : > { %1452 = vset.pattern.permute.xlu1 %v1639_v0  ;;  %vm725_vm3 = vmand %vm1896_vm8, %vm709_vm13 }
  0xcb   : > { %692 = vperm.xlu1 %1452, %v464_v16   ;;  %vm2067_vm13 = vmand %vm1889_vm6, %vm610_vm1 }
  0xcc   : > { %1453 = vset.pattern.permute.xlu2 %v1642_v6 }
  0xcd   : > { %792 = vperm.xlu2 %1453, %v464_v16   ;;  %1278 = vmatmul.msk.f32.gmra.mxu1 %vm890_vm2, %v1262_v24  ;;  %v675_v30 = vpop.permute.xlu2 %674  ;;  %v1024_v16 = vld [vmem:[#allocation7 + $0x20] sm:$0xff] }
  0xcf   : > { %v569_v26 = vpop.permute.xlu0 %568 }
  0xd0   : > { %vm609_vm10 = vcmp.eq.s32.totalorder %v569_v26, %v1874_v47  ;;  %v363_v26 = vld [vmem:[%s1848_s23 + $0x58] sm:$0xff] }
  0xd1   : > { %vm625_vm4 = vmand %vm1889_vm6, %vm609_vm10  ;;  %v488_v28 = vpop.permute.xlu1 %487  ;;  %434 = vmatmul.f32.gmra.mxu0 %v362_v13 }
  0xd2   : > { %vm641_vm5 = vmor %vm541_vm14, %vm625_vm4  ;;  %vm526_vm7 = vcmp.eq.s32.totalorder %v488_v28, %v1868_v46 }
  0xd3   : > { %vm741_vm12 = vmor %vm641_vm5, %vm725_vm3  ;;  %1455 = vset.pattern.permute.xlu1 %v1640_v1 }
  0xd4   : > { %595 = vperm.xlu1 %1455, %v1941_v60   ;;  %vm542_vm14 = vmand %vm2454_vm11, %vm526_vm7 }
  0xd5   : > { %1456 = vset.pattern.permute.xlu2 %v1639_v0  ;;  %vm841_vm3 = vmor %vm741_vm12, %vm2047_vm0  ;;  %vm811_vm12 = vcmp.eq.s32.totalorder %v1881_v50, %v1901_v54  ;;  %v1035_v50 = vld [vmem:[#allocation7 + $0x78] sm:$0xff] }
  0xd6   : > { %695 = vperm.xlu2 %1456, %v1941_v60   ;;  %vm726_vm10 = vmand %vm1896_vm8, %vm710_vm9  ;;  %v1263_v31 = vsel %vm841_vm3, 1.0, %v1643_v9  ;;  %vm527_vm9 = vcmp.eq.s32.totalorder %v491_v23, %v1868_v46  ;;  %v578_v35 = vpop.permute.xlu2 %577  ;;  %1040 = vmatpush.msra.mxu2 %v1035_v50  ;;  %v1021_v23 = vld [vmem:[#allocation7 + $0x8] sm:$0xff] }
  0xd7   : > { %vm642_vm4 = vmor %vm542_vm14, %vm2067_vm13  ;;  %1279 = vmatmul.msk.f32.gmra.mxu1 %vm890_vm2, %v1263_v31  ;;  %vm711_vm13 = vcmp.eq.s32.totalorder %v675_v30, %v1887_v51  ;;  %vm2461_vm14 = vcmp.lt.s32.totalorder %v1868_v46, 8  ;;  %1314 = vmatpush.msrb.mxu3 %v1035_v50 }
  0xd8   : > { %vm742_vm0 = vmor %vm642_vm4, %vm726_vm10  ;;  %1041 = vmatpush.msra.mxu2 %v1034_v55 }
  0xd9   : > { %vm2101_vm11 = vmand %vm1924_vm15, %vm811_vm12  ;;  %vm612_vm12 = vcmp.eq.s32.totalorder %v578_v35, %v1874_v47  ;;  %1315 = vmatpush.msrb.mxu3 %v1034_v55  ;;  %437 = vmatmul.f32.gmra.mxu0 %v363_v26 }
  0xda   : > { %v772_v33 = vpop.permute.xlu1 %771  ;;  %vm543_vm3 = vmand %vm2461_vm14, %vm527_vm9 }
  0xdb   : > { %vm810_vm1 = vcmp.eq.s32.totalorder %v772_v33, %v1901_v54  ;;  %vm727_vm4 = vmand %vm1896_vm8, %vm711_vm13  ;;  %v364_v33 = vld [vmem:[%s1848_s23 + $0x60] sm:$0xff] }
  0xdc   : > { %vm826_vm5 = vmand %vm1924_vm15, %vm810_vm1  ;;  %1457 = vset.pattern.permute.xlu1 %v1642_v6  ;;  %440 = vmatmul.f32.vlgmr.msra.gmra.mxu3 %v364_v33 }
  0xdd   : > { %vm842_vm7 = vmor %vm742_vm0, %vm826_vm5  ;;  %795 = vperm.xlu1 %1457, %v1941_v60  }
  0xde   : > { %v1264_v34 = vsel %vm842_vm7, 1.0, %v1643_v9  ;;  %1458 = vset.pattern.permute.xlu2 %v1641_v2  ;;  %vm628_vm13 = vmand %vm1889_vm6, %vm612_vm12 }
  0xdf   : > { %514 = vperm.xlu2 %1458, %v1987_v12   ;;  %1280 = vmatmul.msk.f32.gmra.mxu1 %vm890_vm2, %v1264_v34  ;;  %v778_v39 = vpop.permute.xlu2 %777  ;;  %v405_v34 = vpop.f32.mrf.mxu0 }
  0xe3   : > { %v575_v38 = vpop.permute.xlu1 %574 }
  0xe4   : > { %vm611_vm10 = vcmp.eq.s32.totalorder %v575_v38, %v1874_v47 }
  0xe5   : > { %vm627_vm0 = vmand %vm1889_vm6, %vm611_vm10  ;;  %1460 = vset.pattern.permute.xlu1 %v1639_v0 }
  0xe6   : > { %vm643_vm1 = vmor %vm543_vm3, %vm627_vm0  ;;  %698 = vperm.xlu1 %1460, %v1987_v12  }
  0xe7   : > { %vm743_vm5 = vmor %vm643_vm1, %vm727_vm4  ;;  %1461 = vset.pattern.permute.xlu2 %v1642_v6  ;;  %v408_v41 = vpop.f32.mrf.mxu0 }
  0xe8   : > { %vm843_vm7 = vmor %vm743_vm5, %vm2101_vm11  ;;  %798 = vperm.xlu2 %1461, %v1987_v12   ;;  %vm812_vm11 = vcmp.eq.s32.totalorder %v778_v39, %v1901_v54  ;;  %v681_v43 = vpop.permute.xlu2 %680  ;;  %v365_v39 = vld [vmem:[%s1848_s23 + $0x68] sm:$0xff] }
  0xe9   : > { %v1265_v40 = vsel %vm843_vm7, 1.0, %v1643_v9  ;;  %vm828_vm10 = vmand %vm1924_vm15, %vm812_vm11  ;;  %443 = vmatmul.f32.gmra.mxu3 %v365_v39 }
  0xea   : > { %1281 = vmatmul.msk.f32.gmra.mxu1 %vm890_vm2, %v1265_v40 }
  0xec   : > { %v494_v42 = vpop.permute.xlu1 %493 }
  0xed   : > { %vm528_vm9 = vcmp.eq.s32.totalorder %v494_v42, %v1868_v46 }
  0xee   : > { %1462 = vset.pattern.permute.xlu1 %v1641_v2  ;;  %vm544_vm3 = vmand %vm2461_vm14, %vm528_vm9  ;;  %vm529_vm9 = vcmp.eq.s32.totalorder %v2027_v20, %v1868_v46  ;;  %v1022_v20 = vld [vmem:[#allocation7 + $0x10] sm:$0xff] }
  0xef   : > { %517 = vperm.xlu1 %1462, %v2052_v27   ;;  %vm644_vm4 = vmor %vm544_vm3, %vm628_vm13  ;;  %vm713_vm13 = vcmp.eq.s32.totalorder %v681_v43, %v1887_v51 }
  0xf0   : > { %1463 = vset.pattern.permute.xlu2 %v1640_v1  ;;  %vm2158_vm3 = vmand %vm2461_vm14, %vm529_vm9 }
  0xf1   : > { %601 = vperm.xlu2 %1463, %v2052_v27   ;;  %v500_v49 = vpop.permute.xlu2 %499 }
  0xf2   : > { %vm530_vm9 = vcmp.eq.s32.totalorder %v500_v49, %v1868_v46 }
  0xf5   : > { %v678_v45 = vpop.permute.xlu1 %677 }
  0xf6   : > { %vm712_vm0 = vcmp.eq.s32.totalorder %v678_v45, %v1887_v51 }
  0xf7   : > { %vm728_vm1 = vmand %vm1896_vm8, %vm712_vm0  ;;  %1465 = vset.pattern.permute.xlu1 %v1642_v6  ;;  %v1033_v6 = vld [vmem:[#allocation7 + $0x68] sm:$0xff] }
  0xf8   : > { %vm744_vm5 = vmor %vm644_vm4, %vm728_vm1  ;;  %801 = vperm.xlu1 %1465, %v2052_v27   ;;  %1042 = vmatpush.msra.mxu2 %v1033_v6 }
  0xf9   : > { %vm844_vm7 = vmor %vm744_vm5, %vm828_vm10  ;;  %1466 = vset.pattern.permute.xlu2 %v1641_v2  ;;  %1316 = vmatpush.msrb.mxu3 %v1033_v6  ;;  %v366_v2 = vld [vmem:[%s1848_s23 + $0x70] sm:$0xff] }
  0xfa   : > { %v1266_v48 = vsel %vm844_vm7, 1.0, %v1643_v9  ;;  %520 = vperm.xlu2 %1466, %v468_v37   ;;  %vm729_vm10 = vmand %vm1896_vm8, %vm713_vm13  ;;  %v784_v60 = vpop.permute.xlu2 %783  ;;  %446 = vmatmul.f32.gmra.mxu3 %v366_v2 }
  0xfb   : > { %1282 = vmatmul.msk.f32.gmra.mxu1 %vm890_vm2, %v1266_v48 }
  0xfe   : > { %v581_v56 = vpop.permute.xlu1 %580 }
  0xff   : > { %vm613_vm12 = vcmp.eq.s32.totalorder %v581_v56, %v1874_v47  ;;  %v411_v56 = vpop.f32.mrf.mxu0 }
 0x100   : > { %1467 = vset.pattern.permute.xlu1 %v1640_v1  ;;  %vm2151_vm11 = vmand %vm1889_vm6, %vm613_vm12  ;;  %v1032_v1 = vld [vmem:[#allocation7 + $0x60] sm:$0xff] }
 0x101   : > { %604 = vperm.xlu1 %1467, %v468_v37   ;;  %vm645_vm4 = vmor %vm2158_vm3, %vm2151_vm11  ;;  %1043 = vmatpush.msra.mxu2 %v1032_v1  ;;  %vm814_vm3 = vcmp.eq.s32.totalorder %v784_v60, %v1901_v54 }
 0x102   : > { %1468 = vset.pattern.permute.xlu2 %v1639_v0  ;;  %v584_v0 = vpop.permute.xlu0 %583  ;;  %1317 = vmatpush.msrb.mxu3 %v1032_v1  ;;  %vm745_vm0 = vmor %vm645_vm4, %vm729_vm10 }
 0x103   : > { %704 = vperm.xlu2 %1468, %v468_v37   ;;  %1044 = vmatpush.msra.mxu2 %v1031_v61  ;;  %vm614_vm7 = vcmp.eq.s32.totalorder %v584_v0, %v1874_v47  ;;  %vm2468_vm11 = vmmov %vm2461_vm14  ;;  %v587_v12 = vpop.permute.xlu2 %586  ;;  %v2240_v37 = vld [vmem:[%s2417_s4] ss:$0 sm:$0xff] }
 0x104   : > { %1318 = vmatpush.msrb.mxu3 %v1031_v61  ;;  %vm2177_vm13 = vmand %vm1889_vm6, %vm614_vm7  ;;  %v406_v40 = vadd.f32 %v2240_v37, %v405_v34  ;;  %v409_v48 = vadd.f32 %v2240_v37, %v408_v41  ;;  %v412_v1 = vadd.f32 %v2240_v37, %v411_v56 }
 0x105   : > { %1045 = vmatpush.msra.mxu2 %v1030_v63  ;;  %vm2184_vm14 = vmand %vm2468_vm11, %vm530_vm9 }
 0x106   : > { %1319 = vmatpush.msrb.mxu3 %v1030_v63  ;;  %vm646_vm10 = vmor %vm2184_vm14, %vm2177_vm13  ;;  %vm2473_vm14 = vcmp.lt.s32.totalorder %v1868_v46, 8 }
 0x107   : > { %v781_v62 = vpop.permute.xlu1 %780  ;;  %1046 = vmatpush.msra.mxu2 %v1029_v3  ;;  %v414_v61 = vpop.f32.mrf.mxu0 }
 0x108   : > { %vm813_vm1 = vcmp.eq.s32.totalorder %v781_v62, %v1901_v54  ;;  %1320 = vmatpush.msrb.mxu3 %v1029_v3  ;;  %v367_v3 = vld [vmem:[%s1848_s23 + $0x78] sm:$0xff]  ;;  %s1576_s23 = sshra.s32 %s1137_s21, 4  ;;  %s1577_s23 = int_to_ptr.hbm [resolvable:$true] %s1576_s23 }
 0x109   : > { %vm829_vm5 = vmand %vm1924_vm15, %vm813_vm1  ;;  %1047 = vmatpush.msra.mxu2 %v1028_v8  ;;  %449 = vmatmul.f32.gmra.mxu3 %v367_v3  ;;  %s1578_s29 = scalar_lea.hbm %s1577_s23, 128  ;;  %p1583_p3 = scmp.lt.s32.totalorder %s1577_s23, %s2420_s7 }
 0x10a   : > { %vm845_vm12 = vmor %vm745_vm0, %vm829_vm5  ;;  %1321 = vmatpush.msrb.mxu3 %v1028_v8  ;;  %v687_v22 = vpop.permute.xlu0 %686  ;;  %p1579_p0 = scmp.ne.s32.totalorder %s1577_s23, %s1578_s29  ;;  %p1584_p4 = scmp.lt.s32.totalorder %s1582_s14, %s1578_s29 }
 0x10b   : > { %v1267_v4 = vsel %vm845_vm12, 1.0, %v1643_v9  ;;  %1048 = vmatpush.msra.mxu2 %v1027_v10  ;;  %vm830_vm0 = vmand %vm1924_vm15, %vm814_vm3  ;;  %vm615_vm12 = vcmp.eq.s32.totalorder %v587_v12, %v1874_v47  ;;  %vm715_vm11 = vcmp.eq.s32.totalorder %v687_v22, %v1887_v51 }
 0x10c   : > { %1283 = vmatmul.msk.f32.gmra.mxu1 %vm890_vm2, %v1267_v4  ;;  %1322 = vmatpush.msrb.mxu3 %v1027_v10  ;;  %v506_v19 = vpop.permute.xlu2 %505  ;;  %vm2205_vm13 = vmand %vm1889_vm6, %vm615_vm12  ;;  %v415_v4 = vadd.f32 %v2240_v37, %v414_v61  ;;  %p1580_p1 = pnand %p1579_p0, %p1724_p5  ;;  %p1585_p7 = por %p1584_p4, %p1583_p3 }
 0x10d   : > { %1049 = vmatpush.msra.mxu2 %v1026_v14  ;;  %vm532_vm12 = vcmp.eq.s32.totalorder %v506_v19, %v1868_v46 }
 0x10e   : > { %1323 = vmatpush.msrb.mxu3 %v1026_v14  ;;  %p1581_p2 = pneg %p1580_p1 }
 0x10f   : > { %1050 = vmatpush.msra.mxu2 %v1025_v15 }
 0x110   : > { %v684_v11 = vpop.permute.xlu1 %683  ;;  %1324 = vmatpush.msrb.mxu3 %v1025_v15  ;;  %p1586_p8 = pnand %p1585_p7, %p1581_p2 }
 0x111   : > { %vm714_vm4 = vcmp.eq.s32.totalorder %v684_v11, %v1887_v51  ;;  %1051 = vmatpush.msra.mxu2 %v1024_v16 }
 0x112   : > { %vm730_vm1 = vmand %vm1896_vm8, %vm714_vm4  ;;  %1325 = vmatpush.msrb.mxu3 %v1024_v16  ;;  %v790_v29 = vpop.permute.xlu0 %789 }
 0x113   : > { %vm746_vm5 = vmor %vm646_vm10, %vm730_vm1  ;;  %1052 = vmatpush.msra.mxu2 %v1023_v18 }
 0x114   : > { %vm846_vm7 = vmor %vm746_vm5, %vm830_vm0  ;;  %1326 = vmatpush.msrb.mxu3 %v1023_v18 }
 0x115   : > { %v1268_v17 = vsel %vm846_vm7, 1.0, %v1643_v9  ;;  %1053 = vmatpush.msra.mxu2 %v1022_v20  ;;  %vm731_vm10 = vmand %vm1896_vm8, %vm715_vm11  ;;  %v690_v28 = vpop.permute.xlu2 %689 }
 0x116   : > { %1284 = vmatmul.msk.f32.gmra.mxu1 %vm890_vm2, %v1268_v17  ;;  %1327 = vmatpush.msrb.mxu3 %v1022_v20  ;;  %vm2474_vm11 = vmmov %vm2473_vm14 }
 0x117   : > { %1054 = vmatpush.msra.mxu2 %v1021_v23 }
 0x118   : > { %1328 = vmatpush.msrb.mxu3 %v1021_v23 }
 0x119   : > { %v503_v21 = vpop.permute.xlu1 %502  ;;  %1055 = vmatpush.msra.mxu2 %v1020_v25 }
 0x11a   : > { %vm531_vm9 = vcmp.eq.s32.totalorder %v503_v21, %v1868_v46  ;;  %1329 = vmatpush.msrb.mxu3 %v1020_v25  ;;  %v512_v50 = vpop.permute.xlu0 %511 }
 0x11b   : > { %vm547_vm3 = vmand %vm2473_vm14, %vm531_vm9  ;;  %vm816_vm9 = vcmp.eq.s32.totalorder %v790_v29, %v1901_v54 }
 0x11c   : > { %vm647_vm4 = vmor %vm547_vm3, %vm2205_vm13  ;;  %vm716_vm13 = vcmp.eq.s32.totalorder %v690_v28, %v1887_v51 }
 0x11d   : > { %vm747_vm0 = vmor %vm647_vm4, %vm731_vm10 }
 0x11e   : > { %vm548_vm14 = vmand %vm2474_vm11, %vm532_vm12  ;;  %v593_v32 = vpop.permute.xlu2 %592  ;;  %v417_v12 = vpop.f32.mrf.mxu0 }
 0x11f   : > { %vm832_vm3 = vmand %vm1924_vm15, %vm816_vm9  ;;  %vm617_vm12 = vcmp.eq.s32.totalorder %v593_v32, %v1874_v47  ;;  %v418_v14 = vadd.f32 %v2240_v37, %v417_v12 }
 0x120   : > { %vm732_vm4 = vmand %vm1896_vm8, %vm716_vm13 }
 0x121   : > { %vm633_vm13 = vmand %vm1889_vm6, %vm617_vm12  ;;  %vm534_vm12 = vcmp.eq.s32.totalorder %v512_v50, %v1868_v46 }
 0x122   : > { %v787_v27 = vpop.permute.xlu1 %786  ;;  %v599_v62 = vpop.permute.xlu0 %598 }
 0x123   : > { %vm815_vm1 = vcmp.eq.s32.totalorder %v787_v27, %v1901_v54 }
 0x124   : > { %vm831_vm5 = vmand %vm1924_vm15, %vm815_vm1 }
 0x125   : > { %vm847_vm7 = vmor %vm747_vm0, %vm831_vm5 }
 0x126   : > { %v1269_v30 = vsel %vm847_vm7, 1.0, %v1643_v9  ;;  %v420_v21 = vpop.f32.mrf.mxu0 }
 0x127   : > { %1285 = vmatmul.msk.f32.gmra.mxu1 %vm890_vm2, %v1269_v30  ;;  %v793_v38 = vpop.permute.xlu2 %792  ;;  %v421_v22 = vadd.f32 %v2240_v37, %v420_v21 }
 0x128   : > { %vm817_vm11 = vcmp.eq.s32.totalorder %v793_v38, %v1901_v54 }
 0x12a   : > { %v702_v19 = vpop.permute.xlu0 %701 }
 0x12b   : > { %v590_v31 = vpop.permute.xlu1 %589 }
 0x12c   : > { %vm616_vm10 = vcmp.eq.s32.totalorder %v590_v31, %v1874_v47 }
 0x12d   : > { %vm632_vm0 = vmand %vm1889_vm6, %vm616_vm10 }
 0x12e   : > { %vm648_vm1 = vmor %vm548_vm14, %vm632_vm0  ;;  %vm2475_vm14 = vcmp.lt.s32.totalorder %v1868_v46, 8  ;;  %v423_v30 = vpop.f32.mrf.mxu0 }
 0x12f   : > { %vm748_vm5 = vmor %vm648_vm1, %vm732_vm4 }
 0x130   : > { %vm848_vm7 = vmor %vm748_vm5, %vm832_vm3  ;;  %v696_v45 = vpop.permute.xlu2 %695 }
 0x131   : > { %v1270_v35 = vsel %vm848_vm7, 1.0, %v1643_v9  ;;  %vm833_vm10 = vmand %vm1924_vm15, %vm817_vm11 }
 0x132   : > { %1286 = vmatmul.msk.f32.gmra.mxu1 %vm890_vm2, %v1270_v35  ;;  %v805_v27 = vpop.permute.xlu0 %804 }
 0x134   : > { %v509_v36 = vpop.permute.xlu1 %508 }
 0x135   : > { %vm533_vm9 = vcmp.eq.s32.totalorder %v509_v36, %v1868_v46 }
 0x136   : > { %vm549_vm3 = vmand %vm2475_vm14, %vm533_vm9  ;;  %v426_v58 = vpop.f32.mrf.mxu0 }
 0x137   : > { %vm649_vm4 = vmor %vm549_vm3, %vm633_vm13 }
 0x138   : > { %vm2476_vm13 = vmmov %vm2475_vm14  ;;  %vm718_vm14 = vcmp.eq.s32.totalorder %v696_v45, %v1887_v51 }
 0x139   : > { %v515_v59 = vpop.permute.xlu2 %514  ;;  %vm550_vm11 = vmand %vm2476_vm13, %vm534_vm12 }
 0x13a   : > { %v956_v42 = vpop.f32.mrf.mxu1 }
 0x13b   : > { %v1004_v43 = vmul.f32 %v956_v42, %v406_v40 }
 0x13d   : > { %v693_v44 = vpop.permute.xlu1 %692  ;;  %1056 = vmatmul.f32.vlgmr.msra.gmra.mxu2 %v1004_v43 }
 0x13e   : > { %vm717_vm0 = vcmp.eq.s32.totalorder %v693_v44, %v1887_v51  ;;  %v429_v52 = vpop.f32.mrf.mxu0 }
 0x13f   : > { %vm733_vm1 = vmand %vm1896_vm8, %vm717_vm0  ;;  %v430_v34 = vadd.f32 %v2240_v37, %v429_v52 }
 0x140   : > { %vm749_vm5 = vmor %vm649_vm4, %vm733_vm1 }
 0x141   : > { %vm849_vm7 = vmor %vm749_vm5, %vm833_vm10 }
 0x142   : > { %v1271_v49 = vsel %vm849_vm7, 1.0, %v1643_v9  ;;  %v959_v55 = vpop.f32.mrf.mxu1  ;;  %vm734_vm10 = vmand %vm1896_vm8, %vm718_vm14  ;;  %vm619_vm7 = vcmp.eq.s32.totalorder %v599_v62, %v1874_v47  ;;  %v799_v5 = vpop.permute.xlu2 %798 }
 0x143   : > { %1287 = vmatmul.msk.f32.gmra.mxu1 %vm890_vm2, %v1271_v49  ;;  %v1005_v6 = vmul.f32 %v959_v55, %v409_v48  ;;  %vm2280_vm13 = vmand %vm1889_vm6, %vm619_vm7  ;;  %v2339_v49 = vld [vmem:[%s2419_s6] ss:$0 sm:$0xff] }
 0x145   : > { %1059 = vmatmul.f32.gmra.mxu2 %v1005_v6 }
 0x146   : > { %v596_v57 = vpop.permute.xlu1 %595  ;;  %v432_v38 = vpop.f32.mrf.mxu0 }
 0x147   : > { %vm618_vm9 = vcmp.eq.s32.totalorder %v596_v57, %v1874_v47 }
 0x148   : > { %vm634_vm3 = vmand %vm1889_vm6, %vm618_vm9  ;;  %vm535_vm9 = vcmp.eq.s32.totalorder %v515_v59, %v1868_v46 }
 0x149   : > { %vm650_vm4 = vmor %vm550_vm11, %vm634_vm3  ;;  %vm2479_vm11 = vcmp.lt.s32.totalorder %v1868_v46, 8  ;;  %vm819_vm3 = vcmp.eq.s32.totalorder %v799_v5, %v1901_v54 }
 0x14a   : > { %v962_v0 = vpop.f32.mrf.mxu1  ;;  %vm750_vm0 = vmor %vm650_vm4, %vm734_vm10 }
 0x14b   : > { %v1006_v60 = vmul.f32 %v962_v0, %v412_v1  ;;  %vm551_vm14 = vmand %vm2479_vm11, %vm535_vm9  ;;  %v602_v15 = vpop.permute.xlu2 %601  ;;  %vm720_vm11 = vcmp.eq.s32.totalorder %v702_v19, %v1887_v51 }
 0x14c   : > { %vm651_vm10 = vmor %vm551_vm14, %vm2280_vm13  ;;  %vm2480_vm14 = vcmp.lt.s32.totalorder %v1868_v46, 8 }
 0x14d   : > { %1062 = vmatmul.f32.gmra.mxu2 %v1006_v60 }
 0x14e   : > { %v435_v41 = vpop.f32.mrf.mxu0 }
 0x14f   : > { %v796_v63 = vpop.permute.xlu1 %795  ;;  %v436_v42 = vadd.f32 %v2240_v37, %v435_v41 }
 0x150   : > { %vm818_vm1 = vcmp.eq.s32.totalorder %v796_v63, %v1901_v54 }
 0x151   : > { %vm834_vm5 = vmand %vm1924_vm15, %vm818_vm1 }
 0x152   : > { %vm850_vm12 = vmor %vm750_vm0, %vm834_vm5 }
 0x153   : > { %v1272_v7 = vsel %vm850_vm12, 1.0, %v1643_v9  ;;  %vm835_vm0 = vmand %vm1924_vm15, %vm819_vm3  ;;  %vm620_vm12 = vcmp.eq.s32.totalorder %v602_v15, %v1874_v47 }
 0x154   : > { %1288 = vmatmul.msk.f32.gmra.mxu1 %vm890_vm2, %v1272_v7  ;;  %v965_v10 = vpop.f32.mrf.mxu1  ;;  %vm636_vm13 = vmand %vm1889_vm6, %vm620_vm12  ;;  %v521_v23 = vpop.permute.xlu2 %520 }
 0x155   : > { %v1007_v11 = vmul.f32 %v965_v10, %v415_v4  ;;  %vm537_vm12 = vcmp.eq.s32.totalorder %v521_v23, %v1868_v46 }
 0x156   : > { %v438_v45 = vpop.f32.mrf.mxu0 }
 0x157   : > { %1065 = vmatmul.f32.gmra.mxu2 %v1007_v11  ;;  %v439_v48 = vadd.f32 %v2240_v37, %v438_v45 }
 0x158   : > { %v699_v13 = vpop.permute.xlu1 %698 }
 0x159   : > { %vm719_vm4 = vcmp.eq.s32.totalorder %v699_v13, %v1887_v51 }
 0x15a   : > { %vm735_vm1 = vmand %vm1896_vm8, %vm719_vm4 }
 0x15b   : > { %vm751_vm5 = vmor %vm651_vm10, %vm735_vm1 }
 0x15c   : > { %vm851_vm7 = vmor %vm751_vm5, %vm835_vm0  ;;  %v968_v16 = vpop.f32.mrf.mxu1 }
 0x15d   : > { %v1273_v17 = vsel %vm851_vm7, 1.0, %v1643_v9  ;;  %v1008_v18 = vmul.f32 %v968_v16, %v418_v14  ;;  %vm736_vm10 = vmand %vm1896_vm8, %vm720_vm11  ;;  %v705_v29 = vpop.permute.xlu2 %704 }
 0x15e   : > { %1289 = vmatmul.msk.f32.gmra.mxu1 %vm890_vm2, %v1273_v17  ;;  %vm2481_vm11 = vmmov %vm2480_vm14 }
 0x15f   : > { %1068 = vmatmul.f32.gmra.mxu2 %v1008_v18  ;;  %v441_v1 = vpop.f32.mrf.mxu3 }
 0x160   : > { %v442_v59 = vadd.f32 %v2240_v37, %v441_v1 }
 0x161   : > { %v518_v20 = vpop.permute.xlu1 %517 }
 0x162   : > { %vm536_vm9 = vcmp.eq.s32.totalorder %v518_v20, %v1868_v46 }
 0x163   : > { %vm552_vm3 = vmand %vm2480_vm14, %vm536_vm9  ;;  %vm821_vm9 = vcmp.eq.s32.totalorder %v805_v27, %v1901_v54 }
 0x164   : > { %vm652_vm4 = vmor %vm552_vm3, %vm636_vm13  ;;  %vm721_vm13 = vcmp.eq.s32.totalorder %v705_v29, %v1887_v51 }
 0x165   : > { %vm752_vm0 = vmor %vm652_vm4, %vm736_vm10 }
 0x166   : > { %vm553_vm14 = vmand %vm2481_vm11, %vm537_vm12 }
 0x167   : > { %v971_v24 = vpop.f32.mrf.mxu1  ;;  %vm837_vm3 = vmand %vm1924_vm15, %vm821_vm9 }
 0x168   : > { %v1009_v25 = vmul.f32 %v971_v24, %v421_v22  ;;  %vm737_vm4 = vmand %vm1896_vm8, %vm721_vm13 }
 0x16a   : > { %v802_v26 = vpop.permute.xlu1 %801  ;;  %1071 = vmatmul.f32.gmra.mxu2 %v1009_v25 }
 0x16b   : > { %vm820_vm1 = vcmp.eq.s32.totalorder %v802_v26, %v1901_v54  ;;  %v424_v54 = vadd.f32 %v2240_v37, %v423_v30 }
 0x16c   : > { %vm836_vm5 = vmand %vm1924_vm15, %vm820_vm1  ;;  %v444_v63 = vpop.f32.mrf.mxu3 }
 0x16d   : > { %vm852_vm7 = vmor %vm752_vm0, %vm836_vm5  ;;  %v445_v3 = vadd.f32 %v2240_v37, %v444_v63 }
 0x16e   : > { %v1274_v28 = vsel %vm852_vm7, 1.0, %v1643_v9 }
 0x16f   : > { %1290 = vmatmul.msk.f32.gmra.mxu1 %vm890_vm2, %v1274_v28 }
 0x173   : > { %v605_v31 = vpop.permute.xlu1 %604 }
 0x174   : > { %vm621_vm10 = vcmp.eq.s32.totalorder %v605_v31, %v1874_v47  ;;  %v427_v47 = vadd.f32 %v2240_v37, %v426_v58 }
 0x175   : > { %vm637_vm0 = vmand %vm1889_vm6, %vm621_vm10 }
 0x176   : > { %vm653_vm1 = vmor %vm553_vm14, %vm637_vm0 }
 0x177   : > { %vm753_vm5 = vmor %vm653_vm1, %vm737_vm4 }
 0x178   : > { %vm853_vm7 = vmor %vm753_vm5, %vm837_vm3  ;;  %v974_v46 = vpop.f32.mrf.mxu1 }
 0x179   : > { %v1010_v51 = vmul.f32 %v974_v46, %v424_v54  ;;  %v1275_v32 = vsel %vm853_vm7, 1.0, %v1643_v9  ;;  %v433_v9 = vadd.f32 %v2240_v37, %v432_v38 }
 0x17a   : > { %1291 = vmatmul.msk.f32.gmra.mxu1 %vm890_vm2, %v1275_v32 }
 0x17b   : > { %1074 = vmatmul.f32.gmra.mxu2 %v1010_v51 }
 0x17d   : > { %v447_v12 = vpop.f32.mrf.mxu3 }
 0x17e   : > { %v448_v13 = vadd.f32 %v2240_v37, %v447_v12 }
 0x189   : > { %v977_v53 = vpop.f32.mrf.mxu1 }
 0x18a   : > { %v1011_v33 = vmul.f32 %v977_v53, %v427_v47 }
 0x18c   : > { %1077 = vmatmul.f32.gmra.mxu2 %v1011_v33  ;;  %v450_v18 = vpop.f32.mrf.mxu3 }
 0x18d   : > { %v451_v19 = vadd.f32 %v2240_v37, %v450_v18 }
 0x193   : > { %v980_v35 = vpop.f32.mrf.mxu1 }
 0x194   : > { %v1012_v36 = vmul.f32 %v980_v35, %v430_v34 }
 0x196   : > { %1080 = vmatmul.f32.gmra.mxu2 %v1012_v36 }
 0x1a4   : > { %v983_v39 = vpop.f32.mrf.mxu1 }
 0x1a5   : > { %v1013_v40 = vmul.f32 %v983_v39, %v433_v9 }
 0x1a7   : > { %1083 = vmatmul.f32.gmra.mxu2 %v1013_v40 }
 0x1af   : > { %v986_v43 = vpop.f32.mrf.mxu1 }
 0x1b0   : > { %v1014_v44 = vmul.f32 %v986_v43, %v436_v42 }
 0x1b2   : > { %1086 = vmatmul.f32.gmra.mxu2 %v1014_v44 }
 0x1c0   : > { %v989_v50 = vpop.f32.mrf.mxu1  ;;  %v1057_v56 = vpop.f32.mrf.mxu2 }
 0x1c1   : > { %v1015_v55 = vmul.f32 %v989_v50, %v439_v48  ;;  %v1058_v6 = vadd.f32 %v2339_v49, %v1057_v56 }
 0x1c3   : > { %1089 = vmatmul.f32.gmra.mxu2 %v1015_v55  ;;  %1105 = vst [vmem:[%s2342_s18] sm:$0xff] %v1058_v6 }
 0x1c8   : > { %v1060_v2 = vpop.f32.mrf.mxu2 }
 0x1c9   : > { %v1061_v57 = vadd.f32 %v2339_v49, %v1060_v2 }
 0x1cb   : > { %1106 = vst [vmem:[%s2342_s18 + $0x8] sm:$0xff] %v1061_v57 }
 0x1d0   : > { %v1063_v0 = vpop.f32.mrf.mxu2 }
 0x1d1   : > { %v992_v60 = vpop.f32.mrf.mxu1  ;;  %v1064_v61 = vadd.f32 %v2339_v49, %v1063_v0 }
 0x1d2   : > { %v1016_v62 = vmul.f32 %v992_v60, %v442_v59 }
 0x1d3   : > { %1107 = vst [vmem:[%s2342_s18 + $0x10] sm:$0xff] %v1064_v61 }
 0x1d4   : > { %1092 = vmatmul.f32.vlgmr.msrb.gmra.mxu3 %v1016_v62 }
 0x1da   : > { %v1066_v4 = vpop.f32.mrf.mxu2 }
 0x1db   : > { %v995_v5 = vpop.f32.mrf.mxu1  ;;  %v1067_v7 = vadd.f32 %v2339_v49, %v1066_v4 }
 0x1dc   : > { %v1017_v8 = vmul.f32 %v995_v5, %v445_v3 }
 0x1dd   : > { %1108 = vst [vmem:[%s2342_s18 + $0x18] sm:$0xff] %v1067_v7 }
 0x1de   : > { %1095 = vmatmul.f32.gmra.mxu3 %v1017_v8 }
 0x1e2   : > { %v1069_v10 = vpop.f32.mrf.mxu2 }
 0x1e3   : > { %v1070_v11 = vadd.f32 %v2339_v49, %v1069_v10 }
 0x1e5   : > { %1109 = vst [vmem:[%s2342_s18 + $0x20] sm:$0xff] %v1070_v11 }
 0x1ec   : > { %v998_v14 = vpop.f32.mrf.mxu1 }
 0x1ed   : > { %v1018_v15 = vmul.f32 %v998_v14, %v448_v13  ;;  %v1072_v16 = vpop.f32.mrf.mxu2 }
 0x1ee   : > { %v1073_v17 = vadd.f32 %v2339_v49, %v1072_v16 }
 0x1ef   : > { %1098 = vmatmul.f32.gmra.mxu3 %v1018_v15 }
 0x1f0   : > { %1110 = vst [vmem:[%s2342_s18 + $0x28] sm:$0xff] %v1073_v17 }
 0x1f7   : > { %v1001_v20 = vpop.f32.mrf.mxu1 }
 0x1f8   : > { %v1019_v21 = vmul.f32 %v1001_v20, %v451_v19 }
 0x1fa   : > { %1101 = vmatmul.f32.gmra.mxu3 %v1019_v21 }
 0x1fe   : > { %v1075_v22 = vpop.f32.mrf.mxu2 }
 0x1ff   : > { %v1076_v23 = vadd.f32 %v2339_v49, %v1075_v22 }
 0x201   : > { %1111 = vst [vmem:[%s2342_s18 + $0x30] sm:$0xff] %v1076_v23 }
 0x20f   : > { %v1078_v24 = vpop.f32.mrf.mxu2 }
 0x210   : > { %v1079_v25 = vadd.f32 %v2339_v49, %v1078_v24 }
 0x212   : > { %1112 = vst [vmem:[%s2342_s18 + $0x38] sm:$0xff] %v1079_v25 }
 0x219   : > { %v1081_v26 = vpop.f32.mrf.mxu2 }
 0x21a   : > { %v1082_v27 = vadd.f32 %v2339_v49, %v1081_v26 }
 0x21c   : > { %1113 = vst [vmem:[%s2342_s18 + $0x40] sm:$0xff] %v1082_v27 }
 0x22a   : > { %v1084_v37 = vpop.f32.mrf.mxu2 }
 0x22b   : > { %v1085_v28 = vadd.f32 %v2339_v49, %v1084_v37 }
 0x22d   : > { %1114 = vst [vmem:[%s2342_s18 + $0x48] sm:$0xff] %v1085_v28 }
 0x235   : > { %v1087_v29 = vpop.f32.mrf.mxu2 }
 0x236   : > { %v1088_v30 = vadd.f32 %v2339_v49, %v1087_v29 }
 0x238   : > { %1115 = vst [vmem:[%s2342_s18 + $0x50] sm:$0xff] %v1088_v30 }
 0x246   : > { %v1090_v31 = vpop.f32.mrf.mxu2 }
 0x247   : > { %v1091_v54 = vadd.f32 %v2339_v49, %v1090_v31 }
 0x249   : > { %1116 = vst [vmem:[%s2342_s18 + $0x58] sm:$0xff] %v1091_v54 }
 0x257   : > { %v1093_v46 = vpop.f32.mrf.mxu3 }
 0x258   : > { %v1094_v51 = vadd.f32 %v2339_v49, %v1093_v46 }
 0x25a   : > { %1117 = vst [vmem:[%s2342_s18 + $0x60] sm:$0xff] %v1094_v51 }
 0x261   : > { %v1096_v32 = vpop.f32.mrf.mxu3 }
 0x262   : > { %v1097_v58 = vadd.f32 %v2339_v49, %v1096_v32 }
 0x264   : > { %1118 = vst [vmem:[%s2342_s18 + $0x68] sm:$0xff] %v1097_v58 }
 0x272   : > { %v1099_v47 = vpop.f32.mrf.mxu3 }
 0x273   : > { %v1100_v53 = vadd.f32 %v2339_v49, %v1099_v47 }
 0x275   : > { %1119 = vst [vmem:[%s2342_s18 + $0x70] sm:$0xff] %v1100_v53 }
 0x27d   : > { %v1102_v33 = vpop.f32.mrf.mxu3 }
 0x27e   : > { %v1103_v52 = vadd.f32 %v2339_v49, %v1102_v33 }
 0x280   : > { %1120 = vst [vmem:[%s2342_s18 + $0x78] sm:$0xff] %v1103_v52 }
 0x281   : > { %1589 = shalt.err (!%p1586_p8)
}
 0x282   : > { %s1644_s9 = smov 128   ;;  %s1645_s18 = smov 8  }
 0x283   : > { %1342 = dma.vmem_to_hbm [thread:$0]  (%p1724_p5), %s1135_s20, 2048, %s1137_s21, %s1122_s22, %s1644_s9, %s1644_s9, %s1645_s18  }
 0x284 PF: > { %p1364_p9 = scmp.ge.s32.totalorder %s1632_s27, 2  ;;  %s1151_s16 = sand.u32 1, %s1620_s24  }
 0x285   : > { %s1152_s2 = scalar_lea.sflag [#allocation4], %s1151_s16 }
 0x286   : > { %p1355_p10 = pnand %p1364_p9, %p1728_p6 }
 0x288   : > { %p1356_p11 = pneg %p1355_p10 }
 0x28a   : > { %1615 = dma.done.wait (%p1356_p11), %s1152_s2, 2048  }
 0x28b   : > { %1617 = vsyncadd (%p1356_p11), %s1152_s2, 4294965248  ;;  %p19_p12 = scmp.ge.s32.totalorder %s1711_s30, 4   ;;  %s2482_s24 = smov %s1624_s25 }
 0x28c   : > { %s2483_s25 = smov %s1628_s26  ;;  %s2484_s26 = smov %s1722_s10 }
 0x28d   : > { %s2485_s27 = smov %s1711_s30  ;;  %21 = sbr.rel (!%p19_p12) target bundleno = 7 (0x7), region = 99 }
 0x292   :  { %1158 = vsyncpa [#allocation3], 1 }
 0x293   :  { %1160 = vsyncpa [#allocation3 + $0x1], 1 }
 0x294   :  { %1161 = vsyncpa [#allocation6], 1 }
 0x295   :  { %1162 = vsyncpa [#allocation4], 1 }
 0x296   :  { %1164 = vsyncpa [#allocation4 + $0x1], 1 }

</bundles_post_ra>
